<compile_context>
chip_gen: v6e
topology: v6e:2x2x1
jax: 0.10.0
libtpu: 0.0.40
codegen_flags: <defaults>
</compile_context>

<pallas_src>
import functools
from typing import NamedTuple, Tuple

import jax
import jax.numpy as jnp
from jax.experimental import pallas as pl
from jax.experimental.pallas import tpu as pltpu


def _round_up(n, m):
    return ((n + m - 1) // m) * m


def _tile_plan(batch):
    """Bucketed (tile_rows TB, padded_batch Bp).

    Small fixed set of block shapes -> bounded recompiles; 256-multiples fill the
    v6e/v7x MXU along M; B in (256, 512] uses TB=256 so the grid has 2 parallel
    steps (one per v7x TensorCore).
    """
    if batch <= 8:
        return 8, 8
    if batch <= 128:
        return 128, 128
    if batch <= 512:
        return 256, _round_up(batch, 256)
    return 512, _round_up(batch, 512)


# ---------------------------------------------------------------------------
# Kernels
# ---------------------------------------------------------------------------
def _tile_mlp(x_ref, w1_ref, b1_ref, w2_ref, b2_ref, w3_ref, b3_ref):
    """One batch tile of the 3-layer MLP.

    x arrives as f32 and is cast to bf16 in-kernel (rides an idle VPU slot);
    matmuls accumulate in f32; bias-add / ReLU stay in f32.  Returns (TB, PA) f32.
    """
    x = x_ref[...].astype(jnp.bfloat16)                               # (TB, F)
    h1 = jnp.dot(x, w1_ref[...], preferred_element_type=jnp.float32) + b1_ref[...]
    h1 = jnp.maximum(h1, 0.0)                                         # f32
    h2 = jnp.dot(h1.astype(jnp.bfloat16), w2_ref[...],
                 preferred_element_type=jnp.float32) + b2_ref[...]
    h2 = jnp.maximum(h2, 0.0)                                         # f32
    q = jnp.dot(h2.astype(jnp.bfloat16), w3_ref[...],
                preferred_element_type=jnp.float32) + b3_ref[...]
    return q                                                          # (TB, PA) f32


def _mlp_kernel(x_ref, w1_ref, b1_ref, w2_ref, b2_ref, w3_ref, b3_ref, o_ref):
    o_ref[...] = _tile_mlp(x_ref, w1_ref, b1_ref, w2_ref, b2_ref,
                           w3_ref, b3_ref).astype(o_ref.dtype)        # bf16 writeback


def _mlp_argmax_tile_kernel(x_ref, w1_ref, b1_ref, w2_ref, b2_ref, w3_ref, b3_ref,
                            val_ref, idx_ref, *, batch, n_actions, tb):
    """Forward + per-tile (max value, flat index) partials over the real entries.

    Fully parallel across the grid (no carried state); each step writes its
    partials broadcast across an (8, 128) lane-dense block.  The tiny cross-tile
    reduce happens in JAX.
    """
    i = pl.program_id(0)
    q = _tile_mlp(x_ref, w1_ref, b1_ref, w2_ref, b2_ref, w3_ref, b3_ref)
    tb_rows, pad_a = q.shape

    row = jax.lax.broadcasted_iota(jnp.int32, (tb_rows, pad_a), 0) + i * tb
    col = jax.lax.broadcasted_iota(jnp.int32, (tb_rows, pad_a), 1)
    valid = (row < batch) & (col < n_actions)
    qm = jnp.where(valid, q, -jnp.inf)

    tile_max = jnp.max(qm, axis=(0, 1), keepdims=True)                # (1, 1) f32
    is_max = (qm == tile_max) & valid
    flat = row * n_actions + col
    big = jnp.int32(jnp.iinfo(jnp.int32).max)
    tile_idx = jnp.min(jnp.where(is_max, flat, big),
                       axis=(0, 1), keepdims=True)                    # (1, 1) i32

    val_ref[...] = jnp.broadcast_to(tile_max, val_ref.shape)
    idx_ref[...] = jnp.broadcast_to(tile_idx, idx_ref.shape)


# ---------------------------------------------------------------------------
# Params preparation (one-time, hoisted out of the per-call hot path)
# ---------------------------------------------------------------------------
class PreparedParams(NamedTuple):
    weights: Tuple[jax.Array, ...]   # (w1, b1, w2, b2, w3, b3) kernel-ready
    input_shape: int
    n_actions: int
    padded_actions: int


def prepare_params(params):
    """Cast weights to bf16 / biases to f32 and zero-pad the last layer to a
    lane-dense 128-wide output.  Call once; reuse across agent_forward /
    agent_get_action calls (get_action runs every env step)."""
    F = params["w1"].shape[0]
    A = params["w3"].shape[1]
    PA = _round_up(max(A, 1), 128)

    w1 = params["w1"].astype(jnp.bfloat16)
    w2 = params["w2"].astype(jnp.bfloat16)
    w3 = params["w3"].astype(jnp.bfloat16)
    b1 = params["b1"].reshape(1, -1).astype(jnp.float32)
    b2 = params["b2"].reshape(1, -1).astype(jnp.float32)
    b3 = params["b3"].reshape(1, -1).astype(jnp.float32)
    if PA != A:
        w3 = jnp.pad(w3, ((0, 0), (0, PA - A)))   # zero columns: free MXU lanes
        b3 = jnp.pad(b3, ((0, 0), (0, PA - A)))

    return PreparedParams(weights=(w1, b1, w2, b2, w3, b3),
                          input_shape=F, n_actions=A, padded_actions=PA)


def _as_prepared(params):
    return params if isinstance(params, PreparedParams) else prepare_params(params)


def _weight_specs(weights):
    # Full-array blocks, same block every grid step -> stay VMEM-resident.
    return [pl.BlockSpec(w.shape, lambda i: (0, 0)) for w in weights]


def _pad_batch(x, Bp):
    B = x.shape[0]
    xp = x.astype(jnp.float32)
    if Bp != B:
        xp = jnp.pad(xp, ((0, Bp - B), (0, 0)))
    return xp


def _cost_estimate(weights, Bp, F, PA, out_bytes):
    flops = 2 * Bp * (F * 128 + 128 * 256 + 256 * PA)
    bytes_accessed = Bp * F * 4                                        # f32 x
    bytes_accessed += sum(int(w.size) * w.dtype.itemsize for w in weights)
    bytes_accessed += out_bytes
    return pl.CostEstimate(flops=flops, transcendentals=0,
                           bytes_accessed=bytes_accessed)


# ---------------------------------------------------------------------------
# Wrappers
# ---------------------------------------------------------------------------
def agent_forward(x, params):
    """Pallas forward pass of the Agent MLP.

    x: (B, input_shape) float32
    params: PreparedParams (preferred) or raw dict of w1,b1,w2,b2,w3,b3
    returns: (B, n_actions) float32 (internally bf16-written, upcast on the small slice)
    """
    p = _as_prepared(params)
    ws = p.weights
    B, F = x.shape
    A, PA = p.n_actions, p.padded_actions
    TB, Bp = _tile_plan(B)
    xp = _pad_batch(x, Bp)
    grid = (Bp // TB,)

    out = pl.pallas_call(
        _mlp_kernel,
        out_shape=jax.ShapeDtypeStruct((Bp, PA), jnp.bfloat16),
        grid=grid,
        in_specs=[pl.BlockSpec((TB, F), lambda i: (i, 0))] + _weight_specs(ws),
        out_specs=pl.BlockSpec((TB, PA), lambda i: (i, 0)),
        compiler_params=pltpu.CompilerParams(dimension_semantics=("parallel",)),
        cost_estimate=_cost_estimate(ws, Bp, F, PA, out_bytes=Bp * PA * 2),
    )(xp, *ws)
    return out[:B, :A].astype(jnp.float32)


def agent_get_action(x, params):
    """Equivalent of Agent.get_action: flattened argmax over the (B, A) Q-values.

    Forward + per-tile max/flat-idx fused in one parallel Pallas kernel (no Q HBM
    writeback); final cross-tile reduce is a tiny JAX argmax over num_tiles values.
    """
    p = _as_prepared(params)
    ws = p.weights
    B, F = x.shape
    A, PA = p.n_actions, p.padded_actions
    TB, Bp = _tile_plan(B)
    xp = _pad_batch(x, Bp)
    G = Bp // TB

    kernel = functools.partial(_mlp_argmax_tile_kernel, batch=B, n_actions=A, tb=TB)
    vals, idxs = pl.pallas_call(
        kernel,
        out_shape=(jax.ShapeDtypeStruct((8 * G, 128), jnp.float32),
                   jax.ShapeDtypeStruct((8 * G, 128), jnp.int32)),
        grid=(G,),
        in_specs=[pl.BlockSpec((TB, F), lambda i: (i, 0))] + _weight_specs(ws),
        out_specs=[pl.BlockSpec((8, 128), lambda i: (i, 0)),
                   pl.BlockSpec((8, 128), lambda i: (i, 0))],
        compiler_params=pltpu.CompilerParams(dimension_semantics=("parallel",)),
        cost_estimate=_cost_estimate(ws, Bp, F, PA, out_bytes=2 * 8 * G * 128 * 4),
    )(xp, *ws)

    # Tiny final reduce over per-tile partials (earliest tile wins ties, matching
    # flattened-argmax / first-occurrence semantics).
    tile_vals = vals[::8, 0]            # (G,)
    tile_idxs = idxs[::8, 0]            # (G,)
    best_tile = jnp.argmax(tile_vals)
    return tile_idxs[best_tile]


# ---------------------------------------------------------------------------
# Init + reference + test
# ---------------------------------------------------------------------------
def init_params(key, input_shape, n_actions):
    """Deterministic init mimicking nn.Linear's U(-1/sqrt(fan_in), 1/sqrt(fan_in))."""
    def linear(key, fan_in, fan_out):
        kw, kb = jax.random.split(key)
        bound = 1.0 / jnp.sqrt(jnp.float32(fan_in))
        w = jax.random.uniform(kw, (fan_in, fan_out), jnp.float32, -bound, bound)
        b = jax.random.uniform(kb, (1, fan_out), jnp.float32, -bound, bound)
        return w, b

    k1, k2, k3 = jax.random.split(key, 3)
    w1, b1 = linear(k1, input_shape, 128)
    w2, b2 = linear(k2, 128, 256)
    w3, b3 = linear(k3, 256, n_actions)
    return {"w1": w1, "b1": b1, "w2": w2, "b2": b2, "w3": w3, "b3": b3}


def _reference_forward(x, params):
    """Pure-JAX reference with matching bf16-matmul / f32-accumulate numerics."""
    h1 = jnp.dot(x.astype(jnp.bfloat16), params["w1"].astype(jnp.bfloat16),
                 preferred_element_type=jnp.float32) + params["b1"]
    h1 = jnp.maximum(h1, 0.0)
    h2 = jnp.dot(h1.astype(jnp.bfloat16), params["w2"].astype(jnp.bfloat16),
                 preferred_element_type=jnp.float32) + params["b2"]
    h2 = jnp.maximum(h2, 0.0)
    return jnp.dot(h2.astype(jnp.bfloat16), params["w3"].astype(jnp.bfloat16),
                   preferred_element_type=jnp.float32) + params["b3"]


if __name__ == "__main__":
    key = jax.random.PRNGKey(0)
    k_params, k_x1, k_x2 = jax.random.split(key, 3)

    input_shape = 32   # observation feature size
    n_actions = 4
    params = init_params(k_params, input_shape, n_actions)
    prepped = prepare_params(params)   # one-time weight prep, reused every call

    # --- small inference-style batch (TB=8 bucket, single tile) ---
    batch = 8
    x = jax.random.normal(k_x1, (batch, input_shape), jnp.float32)

    q = jax.block_until_ready(agent_forward(x, prepped))
    q_ref = _reference_forward(x, params)
    assert q.shape == (batch, n_actions)
    # bf16 output writeback -> compare with bf16-level tolerance
    assert jnp.allclose(q, q_ref, atol=2e-2, rtol=2e-2), "forward mismatch (B=8)"

    action = jax.block_until_ready(agent_get_action(x, prepped))
    assert action.shape == ()
    assert int(action) == int(jnp.argmax(q_ref)), "argmax mismatch (B=8)"

    # --- larger batch: exercises TB=256 bucket, row padding, multi-tile parallel argmax ---
    batch2 = 300
    x2 = jax.random.normal(k_x2, (batch2, input_shape), jnp.float32)

    q2 = jax.block_until_ready(agent_forward(x2, prepped))
    q2_ref = _reference_forward(x2, params)
    assert q2.shape == (batch2, n_actions)
    assert jnp.allclose(q2, q2_ref, atol=2e-2, rtol=2e-2), "forward mismatch (B=300)"

    action2 = jax.block_until_ready(agent_get_action(x2, prepped))
    assert int(action2) == int(jnp.argmax(q2_ref)), "argmax mismatch (B=300)"

    print("KERNEL_OK")
</pallas_src>

<mosaic_0001>
module attributes {stable_mosaic.version = 11 : i64} {
  func.func @_mlp_kernel(%arg0: i32, %arg1: memref<8x32xf32, #tpu.memory_space<vmem>>, %arg2: memref<32x128xbf16, #tpu.memory_space<vmem>>, %arg3: memref<1x128xf32, #tpu.memory_space<vmem>>, %arg4: memref<128x256xbf16, #tpu.memory_space<vmem>>, %arg5: memref<1x256xf32, #tpu.memory_space<vmem>>, %arg6: memref<256x128xbf16, #tpu.memory_space<vmem>>, %arg7: memref<1x128xf32, #tpu.memory_space<vmem>>, %arg8: memref<8x128xbf16, #tpu.memory_space<vmem>>) attributes {dimension_semantics = [#tpu.dimension_semantics<parallel>], iteration_bounds = array<i64: 1>, scalar_prefetch = 0 : i64, scratch_operands = 0 : i64, tpu.core_type = #tpu.core_type<tc>, window_params = [{transform_indices = @transform_0, window_bounds = array<i64: 8, 32>}, {pipeline_mode = #tpu.pipeline_mode<synchronous>, transform_indices = @transform_1, window_bounds = array<i64: 32, 128>}, {pipeline_mode = #tpu.pipeline_mode<synchronous>, transform_indices = @transform_2, window_bounds = array<i64: 1, 128>}, {pipeline_mode = #tpu.pipeline_mode<synchronous>, transform_indices = @transform_3, window_bounds = array<i64: 128, 256>}, {pipeline_mode = #tpu.pipeline_mode<synchronous>, transform_indices = @transform_4, window_bounds = array<i64: 1, 256>}, {pipeline_mode = #tpu.pipeline_mode<synchronous>, transform_indices = @transform_5, window_bounds = array<i64: 256, 128>}, {pipeline_mode = #tpu.pipeline_mode<synchronous>, transform_indices = @transform_6, window_bounds = array<i64: 1, 128>}, {transform_indices = @transform_7, window_bounds = array<i64: 8, 128>}]} {
    %c0 = arith.constant 0 : index
    %c0_0 = arith.constant 0 : index
    %0 = vector.load %arg1[%c0, %c0_0] : memref<8x32xf32, #tpu.memory_space<vmem>>, vector<8x32xf32>
    %1 = arith.truncf %0 : vector<8x32xf32> to vector<8x32xbf16>
    %c0_1 = arith.constant 0 : index
    %c0_2 = arith.constant 0 : index
    %2 = vector.load %arg2[%c0_1, %c0_2] : memref<32x128xbf16, #tpu.memory_space<vmem>>, vector<32x128xbf16>
    %cst = arith.constant dense<0.000000e+00> : vector<8x128xf32>
    %3 = tpu.matmul %1, %2, %cst {dimension_numbers = #tpu.dot_dimension_numbers<[1], [0], [0], [1], [0, 0, 1, 1], [], []>} : vector<8x32xbf16>, vector<32x128xbf16>, vector<8x128xf32> -> vector<8x128xf32>
    %c0_3 = arith.constant 0 : index
    %c0_4 = arith.constant 0 : index
    %4 = vector.load %arg3[%c0_3, %c0_4] : memref<1x128xf32, #tpu.memory_space<vmem>>, vector<1x128xf32>
    %5 = vector.broadcast %4 : vector<1x128xf32> to vector<8x128xf32>
    %6 = arith.addf %3, %5 : vector<8x128xf32>
    %cst_5 = arith.constant 0.000000e+00 : f32
    %7 = vector.broadcast %cst_5 : f32 to vector<8x128xf32>
    %8 = arith.maximumf %6, %7 : vector<8x128xf32>
    %9 = arith.truncf %8 : vector<8x128xf32> to vector<8x128xbf16>
    %c0_6 = arith.constant 0 : index
    %c0_7 = arith.constant 0 : index
    %10 = vector.load %arg4[%c0_6, %c0_7] : memref<128x256xbf16, #tpu.memory_space<vmem>>, vector<128x256xbf16>
    %cst_8 = arith.constant dense<0.000000e+00> : vector<8x256xf32>
    %11 = tpu.matmul %9, %10, %cst_8 {dimension_numbers = #tpu.dot_dimension_numbers<[1], [0], [0], [1], [0, 0, 1, 1], [], []>} : vector<8x128xbf16>, vector<128x256xbf16>, vector<8x256xf32> -> vector<8x256xf32>
    %c0_9 = arith.constant 0 : index
    %c0_10 = arith.constant 0 : index
    %12 = vector.load %arg5[%c0_9, %c0_10] : memref<1x256xf32, #tpu.memory_space<vmem>>, vector<1x256xf32>
    %13 = vector.broadcast %12 : vector<1x256xf32> to vector<8x256xf32>
    %14 = arith.addf %11, %13 : vector<8x256xf32>
    %cst_11 = arith.constant 0.000000e+00 : f32
    %15 = vector.broadcast %cst_11 : f32 to vector<8x256xf32>
    %16 = arith.maximumf %14, %15 : vector<8x256xf32>
    %17 = arith.truncf %16 : vector<8x256xf32> to vector<8x256xbf16>
    %c0_12 = arith.constant 0 : index
    %c0_13 = arith.constant 0 : index
    %18 = vector.load %arg6[%c0_12, %c0_13] : memref<256x128xbf16, #tpu.memory_space<vmem>>, vector<256x128xbf16>
    %cst_14 = arith.constant dense<0.000000e+00> : vector<8x128xf32>
    %19 = tpu.matmul %17, %18, %cst_14 {dimension_numbers = #tpu.dot_dimension_numbers<[1], [0], [0], [1], [0, 0, 1, 1], [], []>} : vector<8x256xbf16>, vector<256x128xbf16>, vector<8x128xf32> -> vector<8x128xf32>
    %c0_15 = arith.constant 0 : index
    %c0_16 = arith.constant 0 : index
    %20 = vector.load %arg7[%c0_15, %c0_16] : memref<1x128xf32, #tpu.memory_space<vmem>>, vector<1x128xf32>
    %21 = vector.broadcast %20 : vector<1x128xf32> to vector<8x128xf32>
    %22 = arith.addf %19, %21 : vector<8x128xf32>
    %23 = arith.truncf %22 : vector<8x128xf32> to vector<8x128xbf16>
    %c0_17 = arith.constant 0 : index
    %c0_18 = arith.constant 0 : index
    %24 = vector.load %arg8[%c0_17, %c0_18] : memref<8x128xbf16, #tpu.memory_space<vmem>>, vector<8x128xbf16>
    tpu.vector_store %arg8[%c0_17, %c0_18], %23 {strides = array<i32>} : memref<8x128xbf16, #tpu.memory_space<vmem>>, vector<8x128xbf16>,
    return
  }
  func.func @transform_0(%arg0: i32) -> (i32, i32) {
    %c0_i32 = arith.constant 0 : i32
    %c0_i32_0 = arith.constant 0 : i32
    return %arg0, %c0_i32 : i32, i32
  }
  func.func @transform_1(%arg0: i32) -> (i32, i32) {
    %c0_i32 = arith.constant 0 : i32
    %c0_i32_0 = arith.constant 0 : i32
    %c0_i32_1 = arith.constant 0 : i32
    return %c0_i32, %c0_i32_0 : i32, i32
  }
  func.func @transform_2(%arg0: i32) -> (i32, i32) {
    %c0_i32 = arith.constant 0 : i32
    %c0_i32_0 = arith.constant 0 : i32
    %c0_i32_1 = arith.constant 0 : i32
    return %c0_i32, %c0_i32_0 : i32, i32
  }
  func.func @transform_3(%arg0: i32) -> (i32, i32) {
    %c0_i32 = arith.constant 0 : i32
    %c0_i32_0 = arith.constant 0 : i32
    %c0_i32_1 = arith.constant 0 : i32
    return %c0_i32, %c0_i32_0 : i32, i32
  }
  func.func @transform_4(%arg0: i32) -> (i32, i32) {
    %c0_i32 = arith.constant 0 : i32
    %c0_i32_0 = arith.constant 0 : i32
    %c0_i32_1 = arith.constant 0 : i32
    return %c0_i32, %c0_i32_0 : i32, i32
  }
  func.func @transform_5(%arg0: i32) -> (i32, i32) {
    %c0_i32 = arith.constant 0 : i32
    %c0_i32_0 = arith.constant 0 : i32
    %c0_i32_1 = arith.constant 0 : i32
    return %c0_i32, %c0_i32_0 : i32, i32
  }
  func.func @transform_6(%arg0: i32) -> (i32, i32) {
    %c0_i32 = arith.constant 0 : i32
    %c0_i32_0 = arith.constant 0 : i32
    %c0_i32_1 = arith.constant 0 : i32
    return %c0_i32, %c0_i32_0 : i32, i32
  }
  func.func @transform_7(%arg0: i32) -> (i32, i32) {
    %c0_i32 = arith.constant 0 : i32
    %c0_i32_0 = arith.constant 0 : i32
    return %arg0, %c0_i32 : i32, i32
  }
}

</mosaic_0001>

<bundles_post_ra>
// kernel: tpu_custom_call.1
= control target key start
LH: loop header
LB: loop body
LE: loop exit
PB: predicated region body
PF: predicated region fallthrough
CT: control target
= control target key end

     0   :  { %12 = vsyncpa [#allocation3], 0  ;;  %s813_s0 = inlined_call_operand.hbm [shape: f32[8,32], index: 0, kind: input, shape index: {}]   ;;  %s814_s1 = inlined_call_operand.hbm [shape: bf16[32,128], index: 1, kind: input, shape index: {}]   ;;  %s815_s2 = inlined_call_operand.vmem [shape: f32[1,128], index: 2, kind: input, shape index: {}]   ;;  %s816_s3 = inlined_call_operand.hbm [shape: bf16[128,256], index: 3, kind: input, shape index: {}]   ;;  %s817_s4 = inlined_call_operand.vmem [shape: f32[1,256], index: 4, kind: input, shape index: {}]   ;;  %s818_s5 = inlined_call_operand.hbm [shape: bf16[256,128], index: 5, kind: input, shape index: {}]   ;;  %s819_s6 = inlined_call_operand.vmem [shape: f32[1,128], index: 6, kind: input, shape index: {}]   ;;  %s820_s7 = inlined_call_operand.hbm [shape: bf16[8,128], index: 7, kind: output, shape index: {}]  }
   0x1   :  { %13 = vsyncpa [#allocation6], 0 }
   0x2   :  { %14 = vsyncpa [#allocation9], 0 }
   0x3   :  { %15 = vsyncpa [#allocation4], 0  ;;  %s731_s24 = smov [#allocation5]  }
   0x4   :  { %s31_s25 = sshll.u32 %s731_s24, 4  ;;  %s32_s25 = int_to_ptr.vmem [resolvable:$true] %s31_s25 }
   0x5   :  { %s631_s26 = scalar_lea.vmem %s32_s25, 256  ;;  %p636_p1 = scmp.lt.s32.totalorder %s32_s25, %s32_s25 }
   0x6   :  { %p632_p0 = scmp.ne.s32.totalorder %s32_s25, %s631_s26  ;;  %p637_p2 = scmp.lt.s32.totalorder %s631_s26, %s631_s26 }
   0x8   :  { %p638_p3 = por %p637_p2, %p636_p1 }
   0xa   :  { %p639_p4 = pnand %p638_p3, %p632_p0 }
   0xc   :  { %642 = shalt.err (!%p639_p4)
}
   0xd   :  { %s732_s27 = smov 64   ;;  %s733_s28 = smov 4  }
   0xe   :  { %37 = dma.hbm_to_vmem [thread:$0]  %s814_s1, 256, %s32_s25, [#allocation6], %s732_s27, %s732_s27, %s733_s28  }
   0xf   :  { %s734_s8 = smov [#allocation2]   ;;  %s735_s10 = smov [#allocation7]  }
  0x10   :  { %s22_s9 = sshll.u32 %s734_s8, 4  ;;  %s45_s11 = sshll.u32 %s735_s10, 4  ;;  %s23_s9 = int_to_ptr.vmem [resolvable:$true] %s22_s9  ;;  %s46_s11 = int_to_ptr.vmem [resolvable:$true] %s45_s11 }
  0x11   :  { %s651_s12 = scalar_lea.vmem %s23_s9, 128  ;;  %p656_p6 = scmp.lt.s32.totalorder %s23_s9, %s23_s9 }
  0x12   :  { %p652_p5 = scmp.ne.s32.totalorder %s23_s9, %s651_s12  ;;  %p657_p7 = scmp.lt.s32.totalorder %s651_s12, %s651_s12 }
  0x14   :  { %p658_p8 = por %p657_p7, %p656_p6 }
  0x16   :  { %p659_p9 = pnand %p658_p8, %p652_p5 }
  0x18   :  { %662 = shalt.err (!%p659_p9)
}
  0x19   :  { %25 = dma.hbm_to_vmem [thread:$0]  %s813_s0, 128, %s23_s9, [#allocation3]  }
  0x1a   :  { %s671_s15 = scalar_lea.vmem %s46_s11, 2048  ;;  %p676_p11 = scmp.lt.s32.totalorder %s46_s11, %s46_s11 }
  0x1b   :  { %p672_p10 = scmp.ne.s32.totalorder %s46_s11, %s671_s15  ;;  %p677_p12 = scmp.lt.s32.totalorder %s671_s15, %s671_s15 }
  0x1d   :  { %p678_p13 = por %p677_p12, %p676_p11 }
  0x1f   :  { %p679_p0 = pnand %p678_p13, %p672_p10 }
  0x21   :  { %682 = shalt.err (!%p679_p0)
}
  0x22   :  { %s736_s1 = smov 128   ;;  %s737_s16 = smov 8  }
  0x23   :  { %51 = dma.hbm_to_vmem [thread:$0]  %s816_s3, 2048, %s46_s11, [#allocation6], %s736_s1, %s736_s1, %s737_s16  }
  0x24   :  { %s738_s19 = smov [#allocation8]  }
  0x25   :  { %s59_s20 = sshll.u32 %s738_s19, 4  ;;  %s60_s20 = int_to_ptr.vmem [resolvable:$true] %s59_s20 }
  0x26   :  { %s691_s21 = scalar_lea.vmem %s60_s20, 2048  ;;  %p696_p2 = scmp.lt.s32.totalorder %s60_s20, %s60_s20 }
  0x27   :  { %p692_p1 = scmp.ne.s32.totalorder %s60_s20, %s691_s21  ;;  %p697_p3 = scmp.lt.s32.totalorder %s691_s21, %s691_s21 }
  0x29   :  { %p698_p4 = por %p697_p3, %p696_p2 }
  0x2b   :  { %p699_p5 = pnand %p698_p4, %p692_p1 }
  0x2d   :  { %702 = shalt.err (!%p699_p5)
}
  0x2e   :  { %65 = dma.hbm_to_vmem [thread:$0]  %s818_s5, 2048, %s60_s20, [#allocation9], %s732_s27, %s732_s27, %s733_s28  }
  0x2f   :  { %723 = dma.done.wait [#allocation3], 128  }
  0x30   :  { %724 = vsyncadd [#allocation3], 4294967168 }
  0x31   :  { %725 = dma.done.wait [#allocation6], 2304  }
  0x32   :  { %726 = vsyncadd [#allocation6], 4294964992 }
  0x33   :  { %727 = dma.done.wait [#allocation9], 2048  }
  0x34   :  { %728 = vsyncadd [#allocation9], 4294965248  ;;  %v739_v0 = vmov 0.0   ;;  %vm740_vm0 = vmmov 0   ;;  %v581_v1 = vld [vmem:[#allocation5 + $0x8] sm:$0xff]   ;;  %v582_v2 = vld [vmem:[#allocation5] sm:$0xff]   ;;  %v170_v46 = vlaneseq }
  0x35   :  { %561 = vmatprep.subr.bf16.mxu0 %v739_v0  ;;  %565 = vmatprep.mubr.msk.bf16.mxu0 %vm740_vm0, %v739_v0  ;;  %v81_v3 = vld [vmem:[#allocation2] sm:$0xff]  ;;  %v583_v4 = vld [vmem:[#allocation7 + $0x74] ss:$8 sps:$4 sm:$0xff]   ;;  %v585_v5 = vld [vmem:[#allocation7 + $0x70] ss:$8 sps:$4 sm:$0xff]   ;;  %vm106_vm1 = vcmask 261120  }
  0x36   :  { %562 = vmatpush3.bf16.msra.mxu0 %v581_v1  ;;  %v586_v6 = vld [vmem:[#allocation7 + $0x64] ss:$8 sps:$4 sm:$0xff]   ;;  %v82_v7 = vpack.c.bf16 %v81_v3, %v81_v3  ;;  %260 = vmatprep.subr.bf16.mxu1 %v583_v4  ;;  %v588_v8 = vld [vmem:[#allocation7 + $0x60] ss:$8 sps:$4 sm:$0xff]   ;;  %v589_v9 = vld [vmem:[#allocation7 + $0x54] ss:$8 sps:$4 sm:$0xff]  }
  0x37   :  { %563 = vmatprep.subr.bf16.mxu0 %v739_v0  ;;  %261 = vmatpush1.bf16.msra.mxu1 %v585_v5  ;;  %v591_v10 = vld [vmem:[#allocation7 + $0x50] ss:$8 sps:$4 sm:$0xff]   ;;  %v592_v11 = vld [vmem:[#allocation7 + $0x44] ss:$8 sps:$4 sm:$0xff]   ;;  %v594_v12 = vld [vmem:[#allocation7 + $0x40] ss:$8 sps:$4 sm:$0xff]  }
  0x38   :  { %262 = vmatprep.subr.bf16.mxu1 %v586_v6  ;;  %v595_v13 = vld [vmem:[#allocation7 + $0x34] ss:$8 sps:$4 sm:$0xff]   ;;  %v597_v14 = vld [vmem:[#allocation7 + $0x30] ss:$8 sps:$4 sm:$0xff]   ;;  %v598_v15 = vld [vmem:[#allocation7 + $0x24] ss:$8 sps:$4 sm:$0xff]  }
  0x39   :  { %v600_v16 = vld [vmem:[#allocation7 + $0x20] ss:$8 sps:$4 sm:$0xff]   ;;  %v601_v17 = vld [vmem:[#allocation7 + $0x14] ss:$8 sps:$4 sm:$0xff]   ;;  %v603_v18 = vld [vmem:[#allocation7 + $0x10] ss:$8 sps:$4 sm:$0xff]  }
  0x3a   :  { %564 = vmatpush3.bf16.msra.mxu0 %v582_v2  ;;  %v604_v19 = vld [vmem:[#allocation7 + $0x4] ss:$8 sps:$4 sm:$0xff]   ;;  %v606_v20 = vld [vmem:[#allocation7] ss:$8 sps:$4 sm:$0xff]   ;;  %v741_v21 = vmov 0   ;;  %v607_v22 = vld [vmem:[#allocation8 + $0x78] sm:$0xff]  }
  0x3b   :  { %263 = vmatpush1.bf16.msra.mxu1 %v588_v8  ;;  %292 = vmatprep.mubr.bf16.mxu1 %v741_v21  ;;  %v608_v23 = vld [vmem:[#allocation8 + $0x38] sm:$0xff]   ;;  %v609_v24 = vld [vmem:[#allocation8 + $0x70] sm:$0xff]   ;;  %v611_v26 = vld [vmem:[#allocation8 + $0x68] sm:$0xff]   ;;  %v171_v47 = vshrl.u32 %v170_v46, 7 }
  0x3c   :  { %264 = vmatprep.subr.bf16.mxu1 %v589_v9  ;;  %539 = vmatprep.subr.bf16.mxu0 %v607_v22  ;;  %v610_v25 = vld [vmem:[#allocation8 + $0x30] sm:$0xff]   ;;  %v612_v27 = vld [vmem:[#allocation8 + $0x28] sm:$0xff]   ;;  %v613_v28 = vld [vmem:[#allocation8 + $0x60] sm:$0xff]  }
  0x3d   :  { %566 = vmatmul.mubr.msk.bf16.vlgmr.msra.gmra.mxu0 %vm106_vm1, %v82_v7  ;;  %v614_v29 = vld [vmem:[#allocation8 + $0x20] sm:$0xff]   ;;  %v615_v30 = vld [vmem:[#allocation8 + $0x58] sm:$0xff]   ;;  %v617_v32 = vld [vmem:[#allocation8 + $0x50] sm:$0xff]   ;;  %v172_v48 = vsub.s32 0, %v171_v47  ;;  %v176_v50 = vsub.s32 1, %v171_v47 }
  0x3e   :  { %540 = vmatpush3.bf16.msra.mxu0 %v608_v23  ;;  %v616_v31 = vld [vmem:[#allocation8 + $0x18] sm:$0xff]   ;;  %v618_v33 = vld [vmem:[#allocation8 + $0x10] sm:$0xff]   ;;  %v499_v34 = vld [vmem:[%s815_s2] ss:$0 sm:$0xff] }
  0x3f   :  { %265 = vmatpush1.bf16.msra.mxu1 %v591_v10  ;;  %541 = vmatprep.subr.bf16.mxu0 %v609_v24  ;;  %v619_v42 = vld [vmem:[#allocation8 + $0x48] sm:$0xff]   ;;  %v621_v44 = vld [vmem:[#allocation8 + $0x40] sm:$0xff]  }
  0x40   :  { %266 = vmatprep.subr.bf16.mxu1 %v592_v11  ;;  %v620_v43 = vld [vmem:[#allocation8 + $0x8] sm:$0xff]   ;;  %v622_v45 = vld [vmem:[#allocation8] sm:$0xff]  }
  0x41   :  { %v168_v49 = vld [vmem:[%s817_s4] sm:$0x3]  ;;  %s742_s4 = smov [#allocation10]  }
  0x42   :  { %542 = vmatpush3.bf16.msra.mxu0 %v610_v25  ;;  %v173_v51 = vrot.slane %v168_v49, %v172_v48  ;;  %v177_v52 = vrot.slane %v168_v49, %v176_v50  ;;  %v519_v0 = vld [vmem:[%s819_s6] ss:$0 sm:$0xff]  ;;  %s488_s26 = sshll.u32 %s742_s4, 4  ;;  %s489_s26 = int_to_ptr.vmem [resolvable:$true] %s488_s26 }
  0x43   :  { %267 = vmatpush1.bf16.msra.mxu1 %v594_v12  ;;  %543 = vmatprep.subr.bf16.mxu0 %v611_v26  ;;  %s703_s27 = scalar_lea.vmem %s489_s26, 64  ;;  %p708_p7 = scmp.lt.s32.totalorder %s489_s26, %s489_s26 }
  0x44   :  { %268 = vmatprep.subr.bf16.mxu1 %v595_v13  ;;  %p704_p6 = scmp.ne.s32.totalorder %s489_s26, %s703_s27  ;;  %p709_p8 = scmp.lt.s32.totalorder %s703_s27, %s703_s27 }
  0x46   :  { %544 = vmatpush3.bf16.msra.mxu0 %v612_v27  ;;  %p710_p9 = por %p709_p8, %p708_p7 }
  0x47   :  { %269 = vmatpush1.bf16.msra.mxu1 %v597_v14  ;;  %545 = vmatprep.subr.bf16.mxu0 %v613_v28 }
  0x48   :  { %270 = vmatprep.subr.bf16.mxu1 %v598_v15  ;;  %p711_p10 = pnand %p710_p9, %p704_p6 }
  0x4a   :  { %546 = vmatpush3.bf16.msra.mxu0 %v614_v29 }
  0x4b   :  { %271 = vmatpush1.bf16.msra.mxu1 %v600_v16  ;;  %547 = vmatprep.subr.bf16.mxu0 %v615_v30 }
  0x4c   :  { %272 = vmatprep.subr.bf16.mxu1 %v601_v17 }
  0x4e   :  { %548 = vmatpush3.bf16.msra.mxu0 %v616_v31 }
  0x4f   :  { %273 = vmatpush1.bf16.msra.mxu1 %v603_v18  ;;  %549 = vmatprep.subr.bf16.mxu0 %v617_v32 }
  0x50   :  { %274 = vmatprep.subr.bf16.mxu1 %v604_v19 }
  0x52   :  { %550 = vmatpush3.bf16.msra.mxu0 %v618_v33 }
  0x53   :  { %275 = vmatpush1.bf16.msra.mxu1 %v606_v20  ;;  %551 = vmatprep.subr.bf16.mxu0 %v619_v42 }
  0x56   :  { %552 = vmatpush3.bf16.msra.mxu0 %v620_v43 }
  0x57   :  { %553 = vmatprep.subr.bf16.mxu0 %v621_v44 }
  0x5a   :  { %554 = vmatpush3.bf16.msra.mxu0 %v622_v45 }
  0xfd   :  { %v144_v35 = vpop.f32.mrf.mxu0 }
  0xfe   :  { %v145_v36 = vadd.f32 %v499_v34, %v144_v35 }
  0xff   :  { %v567_v37 = vpop.f32.mrf.mxu0 }
 0x100   :  { %v150_v38 = vmax.f32 %v145_v36, 0.0 }
 0x101   :  { %v147_v39 = vpop.f32.mrf.mxu0 }
 0x102   :  { %v151_v40 = vpack.c.bf16 %v150_v38, %v150_v38 }
 0x103   :  { %v568_v41 = vpop.f32.mrf.mxu0 }
 0x104   :  { %293 = vmatmul.mubr.bf16.vlgmr.msra.gmra.mxu1 %v151_v40 }
 0x1c4   :  { %v294_v53 = vpop.f32.mrf.mxu1 }
 0x1c5   :  { %v295_v54 = vadd.f32 %v294_v53, %v173_v51 }
 0x1c6   :  { %v296_v55 = vpop.f32.mrf.mxu1 }
 0x1c7   :  { %v297_v56 = vadd.f32 %v296_v55, %v177_v52  ;;  %v301_v57 = vmax.f32 %v295_v54, 0.0 }
 0x1c8   :  { %v298_v58 = vpop.f32.mrf.mxu1 }
 0x1c9   :  { %v302_v59 = vmax.f32 %v297_v56, 0.0  ;;  %v303_v62 = vpack.c.bf16 %v301_v57, %v301_v57 }
 0x1ca   :  { %v299_v60 = vpop.f32.mrf.mxu1 }
 0x1cb   :  { %v304_v61 = vpack.c.bf16 %v302_v59, %v302_v59 }
 0x1cd   :  { %472 = vmatprep.mubr.bf16.mxu0 %v304_v61 }
 0x1ce   :  { %473 = vmatmul.mubr.bf16.vlgmr.msra.gmra.mxu0 %v303_v62 }
 0x28e   :  { %v555_v63 = vpop.f32.mrf.mxu0 }
 0x290   :  { %v556_v1 = vpop.f32.mrf.mxu0 }
 0x291   :  { %v557_v2 = vadd.f32 %v556_v1, %v555_v63 }
 0x292   :  { %v558_v3 = vpop.f32.mrf.mxu0 }
 0x293   :  { %v475_v4 = vadd.f32 %v557_v2, %v519_v0 }
 0x294   :  { %v559_v5 = vpop.f32.mrf.mxu0 }
 0x295   :  { %v480_v6 = vpack.c.bf16 %v475_v4, %v475_v4 }
 0x297   :  { %481 = vst [vmem:[#allocation10] sm:$0xf] %v480_v6 }
 0x298   :  { %714 = shalt.err (!%p711_p10)
}
 0x299   :  { %491 = dma.vmem_to_hbm [thread:$0]  %s489_s26, 64, %s820_s7, [#allocation4]  }
 0x29a   :  { %729 = dma.done.wait [#allocation4], 64  }
 0x29b   :  { %730 = vsyncadd [#allocation4], 4294967232 }
 0x29c   :  { %495 = vsyncpa [#allocation3], 1 }
 0x29d   :  { %496 = vsyncpa [#allocation6], 1 }
 0x29e   :  { %497 = vsyncpa [#allocation9], 1 }
 0x29f   :  { %498 = vsyncpa [#allocation4], 1 }

</bundles_post_ra>
